<compile_context>
chip_gen: v5e
topology: v5e:2x2
jax: 0.10.0
libtpu: 0.0.40
codegen_flags: <defaults>
</compile_context>

<pallas_src>
import math

import jax
import jax.numpy as jnp
from jax import lax
from jax.experimental import pallas as pl
from jax.experimental.pallas import tpu as pltpu


def _round_up(x, m):
    return (x + m - 1) // m * m


# ----------------------------------------------------------------------------
# Parameter / buffer construction (deterministic, synthetic init)
# ----------------------------------------------------------------------------
def make_positional_encoding(max_len, d_model):
    pos = jnp.arange(max_len, dtype=jnp.float32)[:, None]                 # (L, 1)
    div = jnp.exp(jnp.arange(0, d_model, 2, dtype=jnp.float32)
                  * (-math.log(10000.0) / d_model))                       # (D/2,)
    pe = jnp.zeros((max_len, d_model), jnp.float32)
    pe = pe.at[:, 0::2].set(jnp.sin(pos * div))
    pe = pe.at[:, 1::2].set(jnp.cos(pos * div))
    return pe                                                             # (L, D)


def make_fixed_embedding_table(c_in, d_model):
    # Same formula as FixedEmbedding's weight buffer.
    return make_positional_encoding(c_in, d_model)                        # (c_in, D)


def make_token_conv_weight(key, c_in, d_model):
    # nn.Conv1d(c_in, d_model, kernel_size=3, bias=False), kaiming_normal
    # fan_in = c_in * 3, leaky_relu gain with default negative_slope 0.01.
    fan_in = c_in * 3
    gain = math.sqrt(2.0 / (1.0 + 0.01 ** 2))
    std = gain / math.sqrt(fan_in)
    # Stored in kernel-friendly layout (3, c_in, d_model):
    #   w[k, c, d] == torch_weight[d, c, k]
    return std * jax.random.normal(key, (3, c_in, d_model), jnp.float32)


# ----------------------------------------------------------------------------
# Pallas kernels
# ----------------------------------------------------------------------------
def _embed_kernel_mark(xcat_ref, marks_ref, w_ref, tab_ref, pe_ref, out_ref):
    xc = xcat_ref[0]                                      # (TL, 3C) bf16
    # Fused circular conv: single MXU matmul, f32 accumulation.
    y = jnp.dot(xc, w_ref[...], preferred_element_type=jnp.float32)   # (TL, Dp)

    # Temporal embedding: single multi-hot build + single matmul against the
    # merged (128, Dp) table.  Index fields are pre-offset in the wrapper.
    marks = marks_ref[0]                                  # (TL, 4) int32
    tl = xc.shape[0]
    ntab = tab_ref.shape[0]                               # 128
    iota = lax.broadcasted_iota(jnp.int32, (tl, ntab), 1)
    mh = ((iota == marks[:, 0:1]) | (iota == marks[:, 1:2])
          | (iota == marks[:, 2:3]) | (iota == marks[:, 3:4]))
    mh = mh.astype(tab_ref.dtype)                         # bool -> bf16 directly
    y += jnp.dot(mh, tab_ref[...], preferred_element_type=jnp.float32)

    out_ref[0] = (y + pe_ref[...].astype(jnp.float32)).astype(out_ref.dtype)


def _embed_kernel_nomark(xcat_ref, w_ref, pe_ref, out_ref):
    y = jnp.dot(xcat_ref[0], w_ref[...], preferred_element_type=jnp.float32)
    out_ref[0] = (y + pe_ref[...].astype(jnp.float32)).astype(out_ref.dtype)


# ----------------------------------------------------------------------------
# Wrapper
# ----------------------------------------------------------------------------
def data_embedding(x, x_mark, conv_w, pe, hour_tab, wd_tab, day_tab, mon_tab,
                   *, compute_dtype=jnp.bfloat16, out_dtype=None,
                   seq_tile=512):
    """x: (B, L, c_in) f32;  x_mark: (B, L, 4) int32 [month, day, weekday, hour] or None.

    pe may have max_len >= L rows (as in the PyTorch buffer); it is sliced here.
    out_dtype defaults to compute_dtype (bf16) — halves the dominant HBM
    writeback; pass jnp.float32 if the consumer needs full precision.
    """
    B, L, C = x.shape
    D = conv_w.shape[-1]
    assert pe.shape[0] >= L, "positional-encoding buffer shorter than sequence"
    if out_dtype is None:
        out_dtype = compute_dtype
    Dp = _round_up(D, 128)       # lane-dense output stores

    # --- circular conv as ONE matmul: lane-concat the shifted copies ---------
    # TODO(synk): for large c_in, replace the 3x-wide wrapper concat with a
    #             halo-DMA'd x tile + in-kernel shifts to avoid tripling reads.
    x_prev = jnp.roll(x, 1, axis=1)      # x[(t-1) mod L]
    x_next = jnp.roll(x, -1, axis=1)     # x[(t+1) mod L]
    x_cat = jnp.concatenate([x_prev, x, x_next], axis=-1).astype(compute_dtype)  # (B,L,3C)
    w_cat = conv_w.reshape(3 * C, D)     # rows ordered [w_k0 | w_k1 | w_k2]

    def pad_d(a):
        if Dp == D:
            return a
        return jnp.pad(a, [(0, 0)] * (a.ndim - 1) + [(0, Dp - D)])

    w_cat = pad_d(w_cat).astype(compute_dtype)                # (3C, Dp)
    pe_l = pad_d(pe[:L]).astype(compute_dtype)                # (L, Dp)

    # --- sequence tiling (multiples of 16 for bf16 sublane packing) ----------
    seq_tile = _round_up(seq_tile, 16)
    if L <= seq_tile:
        tl = _round_up(L, 16)
        Lp = tl
        # v7x has 2 TensorCores: make sure the grid has >= 2 tiles so both
        # cores get work when B == 1 / the sequence is short.
        if B * (Lp // tl) < 2 and tl >= 32:
            tl = _round_up(tl // 2, 16)
            Lp = _round_up(L, tl)
    else:
        tl = seq_tile
        Lp = _round_up(L, tl)

    def pad_l(a, axis):
        if Lp == a.shape[axis]:
            return a
        pad = [(0, 0)] * a.ndim
        pad[axis] = (0, Lp - a.shape[axis])
        return jnp.pad(a, pad)

    x_cat = pad_l(x_cat, 1)
    pe_l = pad_l(pe_l, 0)

    # --- grid: L-tiles OUTER, batch INNER --------------------------------------
    # With b innermost, the pe tile and the constant weights keep the same block
    # index across consecutive grid steps, so Pallas does not re-DMA them B times.
    nl = Lp // tl
    grid = (nl, B)
    const2d = lambda a: pl.BlockSpec(a.shape, lambda l, b: (0, 0))

    isz = jnp.dtype(compute_dtype).itemsize
    osz = jnp.dtype(out_dtype).itemsize

    if x_mark is not None:
        # Merge the four fixed tables: rows [hour(24) | weekday(7) | day(32) | month(13)]
        tab = jnp.concatenate([hour_tab, wd_tab, day_tab, mon_tab], axis=0)   # (76, D)
        ntab = _round_up(tab.shape[0], 128)
        tab = jnp.pad(pad_d(tab),
                      ((0, ntab - tab.shape[0]), (0, 0))).astype(compute_dtype)  # (128, Dp)
        offs = jnp.array([0, 24, 24 + 7, 24 + 7 + 32], jnp.int32)
        # x_mark column order: [month, day, weekday, hour]  (freq='h')
        marks = jnp.stack([x_mark[..., 3], x_mark[..., 2],
                           x_mark[..., 1], x_mark[..., 0]],
                          axis=-1).astype(jnp.int32) + offs                   # (B, L, 4)
        marks = pad_l(marks, 1)

        in_specs = [
            pl.BlockSpec((1, tl, 3 * C), lambda l, b: (b, l, 0)),   # x_cat
            pl.BlockSpec((1, tl, 4), lambda l, b: (b, l, 0)),       # offset marks
            const2d(w_cat),                                         # fused conv weight
            const2d(tab),                                           # merged temporal table
            pl.BlockSpec((tl, Dp), lambda l, b: (l, 0)),            # positional
        ]
        args = (x_cat, marks, w_cat, tab, pe_l)
        kernel = _embed_kernel_mark
        tab_bytes = tab.size * isz
        marks_bytes = tl * 4 * 4
    else:
        # Static specialization: no temporal DMA / compute at all.
        in_specs = [
            pl.BlockSpec((1, tl, 3 * C), lambda l, b: (b, l, 0)),
            const2d(w_cat),
            pl.BlockSpec((tl, Dp), lambda l, b: (l, 0)),
        ]
        args = (x_cat, w_cat, pe_l)
        kernel = _embed_kernel_nomark
        tab_bytes = 0
        marks_bytes = 0

    # --- VMEM budget: double-buffered per-tile blocks + constants + headroom,
    #     capped at 32 MiB so it stays safe on v7x (64 MiB physical VMEM / TC).
    per_tile_bytes = (tl * 3 * C * isz + marks_bytes
                      + tl * Dp * isz          # pe tile
                      + tl * Dp * osz)         # out tile
    const_bytes = w_cat.size * isz + tab_bytes
    vmem_limit = int(min(max(2 * per_tile_bytes + 2 * const_bytes + (2 << 20),
                             8 << 20),
                         32 << 20))

    out = pl.pallas_call(
        kernel,
        out_shape=jax.ShapeDtypeStruct((B, Lp, Dp), out_dtype),
        grid_spec=pltpu.PrefetchScalarGridSpec(
            num_scalar_prefetch=0,
            grid=grid,
            in_specs=in_specs,
            out_specs=pl.BlockSpec((1, tl, Dp), lambda l, b: (b, l, 0)),
        ),
        compiler_params=pltpu.CompilerParams(
            dimension_semantics=("parallel", "parallel"),
            vmem_limit_bytes=vmem_limit),
    )(*args)

    # Only materialize the slice when padding was actually applied; otherwise
    # return the kernel output directly (no extra HBM read+write pass).
    if Lp == L and Dp == D:
        return out
    return out[:, :L, :D]


# ----------------------------------------------------------------------------
# Pure-JAX reference (applies the same bf16 rounding to operands, f32 accumulate)
# ----------------------------------------------------------------------------
def data_embedding_ref(x, x_mark, conv_w, pe, hour_tab, wd_tab, day_tab, mon_tab,
                       compute_dtype=jnp.bfloat16):
    cd = lambda a: a.astype(compute_dtype).astype(jnp.float32)
    L = x.shape[1]
    x_prev = jnp.roll(x, 1, axis=1)
    x_next = jnp.roll(x, -1, axis=1)
    xc = cd(jnp.concatenate([x_prev, x, x_next], axis=-1))
    w = cd(conv_w.reshape(-1, conv_w.shape[-1]))
    y = jnp.einsum("blk,kd->bld", xc, w)
    if x_mark is not None:
        temporal = (cd(hour_tab)[x_mark[..., 3]] + cd(wd_tab)[x_mark[..., 2]]
                    + cd(day_tab)[x_mark[..., 1]] + cd(mon_tab)[x_mark[..., 0]])
        y = y + temporal
    return y + cd(pe[:L])[None]


def _check(out, ref, atol, rtol, msg):
    ok = jnp.allclose(out.astype(jnp.float32), ref, atol=atol, rtol=rtol)
    assert bool(ok), msg


if __name__ == "__main__":
    # Main case: lane-dense D, pe buffer longer than the sequence, bf16 output.
    B, L, C_IN, D_MODEL, MAX_LEN = 2, 32, 4, 128, 64

    key = jax.random.PRNGKey(0)
    k_x, k_w, k_m0, k_m1, k_m2, k_m3 = jax.random.split(key, 6)

    x = jax.random.normal(k_x, (B, L, C_IN), jnp.float32)
    x_mark = jnp.stack([
        jax.random.randint(k_m0, (B, L), 0, 13),   # month
        jax.random.randint(k_m1, (B, L), 0, 32),   # day
        jax.random.randint(k_m2, (B, L), 0, 7),    # weekday
        jax.random.randint(k_m3, (B, L), 0, 24),   # hour
    ], axis=-1).astype(jnp.int32)                  # (B, L, 4)

    conv_w = make_token_conv_weight(k_w, C_IN, D_MODEL)
    pe = make_positional_encoding(MAX_LEN, D_MODEL)     # sliced to L inside wrapper
    hour_tab = make_fixed_embedding_table(24, D_MODEL)
    wd_tab = make_fixed_embedding_table(7, D_MODEL)
    day_tab = make_fixed_embedding_table(32, D_MODEL)
    mon_tab = make_fixed_embedding_table(13, D_MODEL)

    out = jax.block_until_ready(
        data_embedding(x, x_mark, conv_w, pe, hour_tab, wd_tab, day_tab, mon_tab))
    ref = data_embedding_ref(x, x_mark, conv_w, pe, hour_tab, wd_tab, day_tab, mon_tab)
    assert out.shape == (B, L, D_MODEL)
    assert out.dtype == jnp.bfloat16
    _check(out, ref, 6e-2, 3e-2, "mismatch vs reference")

    # Explicit f32 output path (consumer needs full precision).
    out_f32 = jax.block_until_ready(
        data_embedding(x, x_mark, conv_w, pe, hour_tab, wd_tab, day_tab, mon_tab,
                       out_dtype=jnp.float32))
    assert out_f32.dtype == jnp.float32
    _check(out_f32, ref, 2e-3, 2e-3, "mismatch (f32 output)")

    # x_mark=None path (statically specialized kernel, value + positional only)
    out_nm = jax.block_until_ready(
        data_embedding(x, None, conv_w, pe, hour_tab, wd_tab, day_tab, mon_tab))
    ref_nm = data_embedding_ref(x, None, conv_w, pe, hour_tab, wd_tab, day_tab, mon_tab)
    _check(out_nm, ref_nm, 6e-2, 3e-2, "mismatch (no-mark)")

    # Unaligned case: exercises D-pad to 128 lanes, L-pad, and the slice path.
    B2, L2, C2, D2 = 2, 20, 3, 32
    k2 = jax.random.split(jax.random.PRNGKey(0), 6)
    x2 = jax.random.normal(k2[0], (B2, L2, C2), jnp.float32)
    xm2 = jnp.stack([
        jax.random.randint(k2[1], (B2, L2), 0, 13),
        jax.random.randint(k2[2], (B2, L2), 0, 32),
        jax.random.randint(k2[3], (B2, L2), 0, 7),
        jax.random.randint(k2[4], (B2, L2), 0, 24),
    ], axis=-1).astype(jnp.int32)
    cw2 = make_token_conv_weight(k2[5], C2, D2)
    pe2 = make_positional_encoding(L2, D2)
    tabs2 = [make_fixed_embedding_table(n, D2) for n in (24, 7, 32, 13)]
    out2 = jax.block_until_ready(data_embedding(x2, xm2, cw2, pe2, *tabs2))
    ref2 = data_embedding_ref(x2, xm2, cw2, pe2, *tabs2)
    assert out2.shape == (B2, L2, D2)
    _check(out2, ref2, 6e-2, 3e-2, "mismatch (unaligned)")

    # B=1 short-sequence case: exercises the 2-tile split for v7x megacore.
    B3, L3, C3, D3 = 1, 40, 4, 128
    k3 = jax.random.split(jax.random.PRNGKey(0), 6)
    x3 = jax.random.normal(k3[0], (B3, L3, C3), jnp.float32)
    xm3 = jnp.stack([
        jax.random.randint(k3[1], (B3, L3), 0, 13),
        jax.random.randint(k3[2], (B3, L3), 0, 32),
        jax.random.randint(k3[3], (B3, L3), 0, 7),
        jax.random.randint(k3[4], (B3, L3), 0, 24),
    ], axis=-1).astype(jnp.int32)
    cw3 = make_token_conv_weight(k3[5], C3, D3)
    pe3 = make_positional_encoding(64, D3)
    tabs3 = [make_fixed_embedding_table(n, D3) for n in (24, 7, 32, 13)]
    out3 = jax.block_until_ready(data_embedding(x3, xm3, cw3, pe3, *tabs3))
    ref3 = data_embedding_ref(x3, xm3, cw3, pe3, *tabs3)
    assert out3.shape == (B3, L3, D3)
    _check(out3, ref3, 6e-2, 3e-2, "mismatch (B=1 split-tile)")

    print("KERNEL_OK")
</pallas_src>

<mosaic_0001>
module attributes {stable_mosaic.version = 11 : i64} {
  func.func @_embed_kernel_mark(%arg0: i32, %arg1: i32, %arg2: memref<1x32x12xbf16, #tpu.memory_space<vmem>>, %arg3: memref<1x32x4xi32, #tpu.memory_space<vmem>>, %arg4: memref<12x128xbf16, #tpu.memory_space<vmem>>, %arg5: memref<128x128xbf16, #tpu.memory_space<vmem>>, %arg6: memref<32x128xbf16, #tpu.memory_space<vmem>>, %arg7: memref<1x32x128xbf16, #tpu.memory_space<vmem>>) attributes {dimension_semantics = [#tpu.dimension_semantics<parallel>, #tpu.dimension_semantics<parallel>], iteration_bounds = array<i64: 1, 2>, scalar_prefetch = 0 : i64, scratch_operands = 0 : i64, tpu.core_type = #tpu.core_type<tc>, window_params = [{transform_indices = @transform_0, window_bounds = array<i64: 1, 32, 12>}, {transform_indices = @transform_1, window_bounds = array<i64: 1, 32, 4>}, {pipeline_mode = #tpu.pipeline_mode<synchronous>, transform_indices = @transform_2, window_bounds = array<i64: 12, 128>}, {pipeline_mode = #tpu.pipeline_mode<synchronous>, transform_indices = @transform_3, window_bounds = array<i64: 128, 128>}, {transform_indices = @transform_4, window_bounds = array<i64: 32, 128>}, {transform_indices = @transform_5, window_bounds = array<i64: 1, 32, 128>}]} {
    %c0 = arith.constant 0 : index
    %c0_0 = arith.constant 0 : index
    %c0_1 = arith.constant 0 : index
    %0 = vector.load %arg2[%c0, %c0_0, %c0_1] : memref<1x32x12xbf16, #tpu.memory_space<vmem>>, vector<1x32x12xbf16>
    %1 = vector.shape_cast %0 : vector<1x32x12xbf16> to vector<32x12xbf16>
    %c0_2 = arith.constant 0 : index
    %c0_3 = arith.constant 0 : index
    %2 = vector.load %arg4[%c0_2, %c0_3] : memref<12x128xbf16, #tpu.memory_space<vmem>>, vector<12x128xbf16>
    %cst = arith.constant dense<0.000000e+00> : vector<32x128xf32>
    %3 = tpu.matmul %1, %2, %cst {dimension_numbers = #tpu.dot_dimension_numbers<[1], [0], [0], [1], [0, 0, 1, 1], [], []>} : vector<32x12xbf16>, vector<12x128xbf16>, vector<32x128xf32> -> vector<32x128xf32>
    %c0_4 = arith.constant 0 : index
    %c0_5 = arith.constant 0 : index
    %c0_6 = arith.constant 0 : index
    %4 = vector.load %arg3[%c0_4, %c0_5, %c0_6] : memref<1x32x4xi32, #tpu.memory_space<vmem>>, vector<1x32x4xi32>
    %5 = vector.shape_cast %4 : vector<1x32x4xi32> to vector<32x4xi32>
    %6 = tpu.iota {dimensions = array<i32: 1>} : vector<32x128xi32>
    %7 = vector.extract_strided_slice %5 {offsets = [0, 0], sizes = [32, 1], strides = [1, 1]} : vector<32x4xi32> to vector<32x1xi32>
    %8 = vector.broadcast %7 : vector<32x1xi32> to vector<32x128xi32>
    %9 = arith.cmpi eq, %6, %8 : vector<32x128xi32>
    %10 = vector.extract_strided_slice %5 {offsets = [0, 1], sizes = [32, 1], strides = [1, 1]} : vector<32x4xi32> to vector<32x1xi32>
    %11 = vector.broadcast %10 : vector<32x1xi32> to vector<32x128xi32>
    %12 = arith.cmpi eq, %6, %11 : vector<32x128xi32>
    %13 = arith.ori %9, %12 : vector<32x128xi1>
    %14 = vector.extract_strided_slice %5 {offsets = [0, 2], sizes = [32, 1], strides = [1, 1]} : vector<32x4xi32> to vector<32x1xi32>
    %15 = vector.broadcast %14 : vector<32x1xi32> to vector<32x128xi32>
    %16 = arith.cmpi eq, %6, %15 : vector<32x128xi32>
    %17 = arith.ori %13, %16 : vector<32x128xi1>
    %18 = vector.extract_strided_slice %5 {offsets = [0, 3], sizes = [32, 1], strides = [1, 1]} : vector<32x4xi32> to vector<32x1xi32>
    %19 = vector.broadcast %18 : vector<32x1xi32> to vector<32x128xi32>
    %20 = arith.cmpi eq, %6, %19 : vector<32x128xi32>
    %21 = arith.ori %17, %20 : vector<32x128xi1>
    %22 = arith.extui %21 : vector<32x128xi1> to vector<32x128xi32>
    %23 = arith.sitofp %22 : vector<32x128xi32> to vector<32x128xf32>
    %24 = arith.truncf %23 : vector<32x128xf32> to vector<32x128xbf16>
    %c0_7 = arith.constant 0 : index
    %c0_8 = arith.constant 0 : index
    %25 = vector.load %arg5[%c0_7, %c0_8] : memref<128x128xbf16, #tpu.memory_space<vmem>>, vector<128x128xbf16>
    %cst_9 = arith.constant dense<0.000000e+00> : vector<32x128xf32>
    %26 = tpu.matmul %24, %25, %cst_9 {dimension_numbers = #tpu.dot_dimension_numbers<[1], [0], [0], [1], [0, 0, 1, 1], [], []>} : vector<32x128xbf16>, vector<128x128xbf16>, vector<32x128xf32> -> vector<32x128xf32>
    %27 = arith.addf %3, %26 : vector<32x128xf32>
    %c0_10 = arith.constant 0 : index
    %c0_11 = arith.constant 0 : index
    %28 = vector.load %arg6[%c0_10, %c0_11] : memref<32x128xbf16, #tpu.memory_space<vmem>>, vector<32x128xbf16>
    %29 = arith.extf %28 : vector<32x128xbf16> to vector<32x128xf32>
    %30 = arith.addf %27, %29 : vector<32x128xf32>
    %31 = arith.truncf %30 : vector<32x128xf32> to vector<32x128xbf16>
    %c0_12 = arith.constant 0 : index
    %c0_13 = arith.constant 0 : index
    %c0_14 = arith.constant 0 : index
    %32 = vector.load %arg7[%c0_12, %c0_13, %c0_14] : memref<1x32x128xbf16, #tpu.memory_space<vmem>>, vector<1x32x128xbf16>
    %33 = vector.shape_cast %32 : vector<1x32x128xbf16> to vector<32x128xbf16>
    %34 = vector.shape_cast %31 : vector<32x128xbf16> to vector<1x32x128xbf16>
    tpu.vector_store %arg7[%c0_12, %c0_13, %c0_14], %34 {strides = array<i32>} : memref<1x32x128xbf16, #tpu.memory_space<vmem>>, vector<1x32x128xbf16>,
    return
  }
  func.func @transform_0(%arg0: i32, %arg1: i32) -> (i32, i32, i32) {
    %c0_i32 = arith.constant 0 : i32
    %c0_i32_0 = arith.constant 0 : i32
    return %arg1, %arg0, %c0_i32 : i32, i32, i32
  }
  func.func @transform_1(%arg0: i32, %arg1: i32) -> (i32, i32, i32) {
    %c0_i32 = arith.constant 0 : i32
    %c0_i32_0 = arith.constant 0 : i32
    return %arg1, %arg0, %c0_i32 : i32, i32, i32
  }
  func.func @transform_2(%arg0: i32, %arg1: i32) -> (i32, i32) {
    %c0_i32 = arith.constant 0 : i32
    %c0_i32_0 = arith.constant 0 : i32
    %c0_i32_1 = arith.constant 0 : i32
    return %c0_i32, %c0_i32_0 : i32, i32
  }
  func.func @transform_3(%arg0: i32, %arg1: i32) -> (i32, i32) {
    %c0_i32 = arith.constant 0 : i32
    %c0_i32_0 = arith.constant 0 : i32
    %c0_i32_1 = arith.constant 0 : i32
    return %c0_i32, %c0_i32_0 : i32, i32
  }
  func.func @transform_4(%arg0: i32, %arg1: i32) -> (i32, i32) {
    %c0_i32 = arith.constant 0 : i32
    %c0_i32_0 = arith.constant 0 : i32
    return %arg0, %c0_i32 : i32, i32
  }
  func.func @transform_5(%arg0: i32, %arg1: i32) -> (i32, i32, i32) {
    %c0_i32 = arith.constant 0 : i32
    %c0_i32_0 = arith.constant 0 : i32
    return %arg1, %arg0, %c0_i32 : i32, i32, i32
  }
}

</mosaic_0001>

<bundles_post_ra>
// kernel: tpu_custom_call.1
= control target key start
LH: loop header
LB: loop body
LE: loop exit
PB: predicated region body
PF: predicated region fallthrough
CT: control target
= control target key end

     0   :  { %10 = vsyncpa [#allocation3], 0  ;;  %s1138_s0 = inlined_call_operand.vmem [shape: bf16[2,32,12], index: 0, kind: input, shape index: {}]   ;;  %s1139_s1 = inlined_call_operand.vmem [shape: s32[2,32,4], index: 1, kind: input, shape index: {}]   ;;  %s1140_s2 = inlined_call_operand.vmem [shape: bf16[12,128], index: 2, kind: input, shape index: {}]   ;;  %s1141_s3 = inlined_call_operand.vmem [shape: bf16[128,128], index: 3, kind: input, shape index: {}]   ;;  %s1142_s4 = inlined_call_operand.vmem [shape: bf16[32,128], index: 4, kind: input, shape index: {}]   ;;  %s1143_s5 = inlined_call_operand.hbm [shape: bf16[2,32,128], index: 5, kind: output, shape index: {}]  }
   0x1   :  { %12 = vsyncpa [#allocation3 + $0x1], 0  ;;  %s994_s18 = smov 0   ;;  %s996_s19 = smov 0  }
   0x2   :  { %s998_s20 = smov 0   ;;  %s1000_s21 = smov 0  }
   0x3   :  { %s1002_s22 = smov 0   ;;  %s1004_s23 = smov 0  }
   0x4 LB: > { %s689_s24 = sadd.s32 4294967295, %s955_s23   ;;  %s690_s25 = sadd.s32 4294967294, %s955_s23   ;;  %s955_s23 = sphi %s1004_s23, %s18_s23   ;;  %s951_s22 = sphi %s1002_s22, %s1150_s22   ;;  %s947_s21 = sphi %s1000_s21, %s1149_s21   ;;  %s943_s20 = sphi %s998_s20, %s1148_s20   ;;  %s939_s19 = sphi %s996_s19, %s1147_s19   ;;  %s935_s18 = sphi %s994_s18, %s1146_s18  }
   0x5   : > { %s27_s26 = sadd.s32 1, %s951_s22  ;;  %s163_s27 = sadd.s32 1, %s943_s20 }
   0x6   : > { %p28_p0 = scmp.ge.s32.totalorder %s27_s26, 2  ;;  %p173_p1 = scmp.ne.s32.totalorder %s943_s20, %s939_s19 }
   0x7   : > { %p174_p2 = scmp.eq.s32.totalorder %s689_s24, 1  ;;  %p179_p3 = scmp.ne.s32.totalorder %s939_s19, %s935_s18 }
   0x8   : > { %s1152_s26 = smov (%p28_p0, %s27_s26), 0  ;;  %p180_p5 = scmp.eq.s32.totalorder %s690_s25, 1 }
   0x9   : > { %p1034_p4 = por %p174_p2, %p173_p1  ;;  %s158_s29 = ssub.s32 %s951_s22, %s1152_s26 }
   0xa   : > { %p694_p6 = scmp.ge.s32.totalorder %s955_s23, 1  ;;  %p161_p7 = scmp.eq.s32.totalorder %s158_s29, 0 }
   0xb   : > { %p1041_p8 = por %p180_p5, %p179_p3  ;;  %p239_p9 = scmp.lt.s32.totalorder %s955_s23, 3 }
   0xc   : > { %s1047_s6 = scalar_select %p161_p7, %s943_s20, %s163_s27  }
   0xd   : > { %p240_p10 = pnand %p694_p6, %p239_p9 }
   0xe   : > { %p286_p11 = scmp.lt.s32.totalorder (!%p240_p10), %s947_s21, 1  ;;  %s282_s9 = sand.u32 (!%p240_p10), 1, %s939_s19  }
   0xf   : > { %243 = sbr.rel (%p240_p10) target bundleno = 331 (0x14b), region = 40  ;;  %s695_s10 = sshll.u32 (!%p240_p10), %s282_s9, 4 }
  0x10   : > { %s772_s14 = sshll.u32 (!%p240_p10), %s947_s21, 4 }
  0x11   : > { %s573_s17 = scalar_lea.hbm (!%p240_p10), %s1143_s5, %s772_s14 }
  0x12   : > { %s576_s25 = sshll.u32 (!%p240_p10), %s573_s17, 4  ;;  %s577_s25 = int_to_ptr.hbm [resolvable:$true] %s576_s25 }
  0x14   : > { %v957_v0 = vmov 1   ;;  %v958_v1 = vmov 0   ;;  %s1051_s7 = scalar_select %p286_p11, %s947_s21, 1  ;;  %v959_v2 = vmov 2   ;;  %v960_v5 = vmov 3   ;;  %v771_v8 = vld [vmem:[%s1141_s3 + $0x38] sm:$0xff] }
  0x15   : > { %864 = vset.pattern.permute.xlu1 %v957_v0  ;;  %863 = vset.pattern.permute.xlu0 %v958_v1  ;;  %v770_v9 = vld [vmem:[%s1141_s3 + $0x30] sm:$0xff]  ;;  %v769_v10 = vld [vmem:[%s1141_s3 + $0x28] sm:$0xff]  ;;  %v768_v11 = vld [vmem:[%s1141_s3 + $0x20] sm:$0xff]  ;;  %vm516_vm0 = vcmask 1045504   ;;  %vm509_vm1 = vcmask 97280   ;;  %v323_v26 = vlaneseq  ;;  %s560_s21 = scalar_lea.sflag [#allocation3], %s282_s9 }
  0x16   : > { %865 = vset.pattern.permute.xlu2 %v959_v2  ;;  %s760_s8 = sshll.u32 %s1051_s7, 5  ;;  %793 = vmatpush.bf16.msra.mxu2 %v771_v8  ;;  %v767_v12 = vld [vmem:[%s1141_s3 + $0x18] sm:$0xff]  ;;  %v750_v13 = vld [vmem:[%s1140_s2] sm:$0xf]  ;;  %v763_v14 = vld [vmem:[%s1140_s2] sm:$0x30] }
  0x17   : > { %s303_s11 = scalar_lea.vmem %s1139_s1, %s760_s8  ;;  %475 = vmatpush.bf16.msra.mxu0 %v771_v8  ;;  %v751_v15 = vor.u32 %v763_v14, %v750_v13  ;;  %s759_s12 = sshll.u32 %s1051_s7, 4  ;;  %v766_v17 = vld [vmem:[%s1141_s3 + $0x10] sm:$0xff]  ;;  %v765_v19 = vld [vmem:[%s1141_s3 + $0x8] sm:$0xff]  ;;  %v764_v20 = vld [vmem:[%s1141_s3] sm:$0xff]  ;;  %v324_v27 = vand.u32 127, %v323_v26 }
  0x18   : > { %v321_v3 = vld [vmem:[%s303_s11 + $0x10] sm:$0xff]  ;;  %v322_v4 = vld [vmem:[%s303_s11 + $0x18] sm:$0xff]  ;;  %v319_v6 = vld [vmem:[%s303_s11] sm:$0xff]  ;;  %s293_s15 = scalar_lea.vmem %s1138_s0, %s759_s12  ;;  %v961_v34 = vmov 1.0|1.0   ;;  %s891_s7 = sshra.s32 %s577_s25, 4  ;;  %s892_s7 = int_to_ptr.hbm [resolvable:$true] %s891_s7 }
  0x19   : > { %348 = vperm.xlu1 %864, %v321_v3   ;;  %332 = vperm.xlu0 %863, %v321_v3   ;;  %v320_v7 = vld [vmem:[%s303_s11 + $0x8] sm:$0xff]  ;;  %v518_v16 = vsel %vm516_vm0, %v751_v15, 0  ;;  %v761_v18 = vld [vmem:[%s293_s15] sm:$0xff]  ;;  %s284_s11 = scalar_lea.vmem [#allocation2], %s695_s10  ;;  %s893_s27 = scalar_lea.hbm %s892_s7, 16 }
  0x1a   : > { %368 = vperm.xlu2 %865, %v321_v3   ;;  %794 = vmatpush.bf16.msra.mxu2 %v770_v9  ;;  %v762_v22 = vld [vmem:[%s293_s15 + $0x8] sm:$0xff]  ;;  %v774_v56 = vld [vmem:[%s1142_s4] sm:$0xff]   ;;  %s574_s24 = sshll.u32 %s284_s11, 4  ;;  %p894_p12 = scmp.ne.s32.totalorder %s892_s7, %s893_s27  ;;  %s575_s24 = int_to_ptr.vmem [resolvable:$true] %s574_s24 }
  0x1b   : > { %476 = vmatpush.bf16.msra.mxu0 %v770_v9  ;;  %527 = vmatpush.bf16.msra.mxu1 %v518_v16  ;;  %v791_v45 = vld [vmem:[%s1142_s4 + $0x8] sm:$0xff]   ;;  %v775_v58 = vunpack.c.l.bf16 %v774_v56  ;;  %v776_v59 = vunpack.c.h.bf16 %v774_v56  ;;  %s897_s10 = scalar_lea.hbm %s1143_s5, 32  ;;  %p898_p1 = scmp.lt.s32.totalorder %s892_s7, %s1143_s5 }
  0x1c   : > { %v779_v48 = vunpack.c.l.bf16 %v791_v45  ;;  %v780_v49 = vunpack.c.h.bf16 %v791_v45  ;;  %p895_p13 = pnand %p894_p12, %p1034_p4  ;;  %p899_p2 = scmp.lt.s32.totalorder %s897_s10, %s893_s27 }
  0x1e   : > { %795 = vmatpush.bf16.msra.mxu2 %v769_v10  ;;  %752 = vmatmul.msk.bf16.vlgmr.msra.gmra.mxu1 %vm509_vm1, %v761_v18  ;;  %p896_p0 = pneg %p895_p13  ;;  %p900_p3 = por %p899_p2, %p898_p1 }
  0x1f   : > { %477 = vmatpush.bf16.msra.mxu0 %v769_v10 }
  0x20   : > { %p901_p5 = pnand %p900_p3, %p896_p0 }
  0x21   : > { %351 = vperm.xlu1 %864, %v322_v4   ;;  %335 = vperm.xlu0 %863, %v322_v4  }
  0x22   : > { %371 = vperm.xlu2 %865, %v322_v4   ;;  %796 = vmatpush.bf16.msra.mxu2 %v768_v11 }
  0x23   : > { %478 = vmatpush.bf16.msra.mxu0 %v768_v11 }
  0x26   : > { %797 = vmatpush.bf16.msra.mxu2 %v767_v12 }
  0x27   : > { %479 = vmatpush.bf16.msra.mxu0 %v767_v12 }
  0x29   : > { %867 = vset.pattern.permute.xlu1 %v960_v5  ;;  %866 = vset.pattern.permute.xlu0 %v960_v5 }
  0x2a   : > { %391 = vperm.xlu1 %867, %v322_v4   ;;  %388 = vperm.xlu0 %866, %v321_v3  }
  0x2b   : > { %868 = vset.pattern.permute.xlu2 %v958_v1  ;;  %798 = vmatpush.bf16.msra.mxu2 %v766_v17 }
  0x2c   : > { %326 = vperm.xlu2 %868, %v319_v6   ;;  %480 = vmatpush.bf16.msra.mxu0 %v766_v17 }
  0x2e   : > { %753 = vmatmul.msk.bf16.gmra.mxu1 %vm509_vm1, %v762_v22 }
  0x2f   : > { %799 = vmatpush.bf16.msra.mxu2 %v765_v19 }
  0x30   : > { %481 = vmatpush.bf16.msra.mxu0 %v765_v19 }
  0x32   : > { %869 = vset.pattern.permute.xlu1 %v958_v1  ;;  %871 = vset.pattern.permute.xlu0 %v957_v0 }
  0x33   : > { %345 = vperm.xlu0 %871, %v320_v7   ;;  %329 = vperm.xlu1 %869, %v320_v7  }
  0x34   : > { %870 = vset.pattern.permute.xlu2 %v957_v0  ;;  %800 = vmatpush.bf16.msra.mxu2 %v764_v20 }
  0x35   : > { %342 = vperm.xlu2 %870, %v319_v6   ;;  %482 = vmatpush.bf16.msra.mxu0 %v764_v20 }
  0x3b   : > { %872 = vset.pattern.permute.xlu1 %v959_v2  ;;  %876 = vset.pattern.permute.xlu0 %v960_v5 }
  0x3c   : > { %362 = vperm.xlu1 %872, %v319_v6  }
  0x3d   : > { %873 = vset.pattern.permute.xlu2 %v959_v2 }
  0x3e   : > { %365 = vperm.xlu2 %873, %v320_v7  }
  0x44   : > { %874 = vset.pattern.permute.xlu1 %v960_v5 }
  0x45   : > { %382 = vperm.xlu1 %874, %v319_v6  }
  0x46   : > { %875 = vset.pattern.permute.xlu2 %v960_v5 }
  0x47   : > { %385 = vperm.xlu2 %875, %v320_v7  }
  0x74   : > { %v369_v21 = vpop.permute.xlu2 %368 }
  0x75   : > { %vm375_vm6 = vcmp.eq.s32.totalorder %v324_v27, %v369_v21 }
  0x7c   : > { %v372_v23 = vpop.permute.xlu2 %371 }
  0x7d   : > { %vm376_vm9 = vcmp.eq.s32.totalorder %v324_v27, %v372_v23 }
  0x86   : > { %v327_v28 = vpop.permute.xlu2 %326 }
  0x8b   : > { %v349_v24 = vpop.permute.xlu1 %348  ;;  %v333_v25 = vpop.permute.xlu0 %332 }
  0x8c   : > { %vm355_vm2 = vcmp.eq.s32.totalorder %v324_v27, %v349_v24  ;;  %vm339_vm3 = vcmp.eq.s32.totalorder %v324_v27, %v333_v25 }
  0x8d   : > { %vm359_vm7 = vmor %vm339_vm3, %vm355_vm2 }
  0x8e   : > { %vm379_vm10 = vmor %vm359_vm7, %vm375_vm6 }
  0x8f   : > { %v343_v33 = vpop.permute.xlu2 %342 }
  0x90   : > { %vm353_vm6 = vcmp.eq.s32.totalorder %v324_v27, %v343_v33 }
  0x93   : > { %v352_v29 = vpop.permute.xlu1 %351  ;;  %v336_v30 = vpop.permute.xlu0 %335 }
  0x94   : > { %vm356_vm4 = vcmp.eq.s32.totalorder %v324_v27, %v352_v29  ;;  %vm340_vm5 = vcmp.eq.s32.totalorder %v324_v27, %v336_v30 }
  0x95   : > { %vm360_vm8 = vmor %vm340_vm5, %vm356_vm4  ;;  %vm337_vm5 = vcmp.eq.s32.totalorder %v324_v27, %v327_v28 }
  0x96   : > { %vm380_vm11 = vmor %vm360_vm8, %vm376_vm9 }
  0x98   : > { %v366_v36 = vpop.permute.xlu2 %365 }
  0x99   : > { %vm374_vm3 = vcmp.eq.s32.totalorder %v324_v27, %v366_v36 }
  0x9b   : > { %v529_v41 = vpop.f32.mrf.mxu1 }
  0x9c   : > { %v392_v31 = vpop.permute.xlu1 %391  ;;  %v389_v32 = vpop.permute.xlu0 %388 }
  0x9d   : > { %vm396_vm12 = vcmp.eq.s32.totalorder %v324_v27, %v392_v31  ;;  %vm395_vm13 = vcmp.eq.s32.totalorder %v324_v27, %v389_v32 }
  0x9e   : > { %vm400_vm14 = vmor %vm380_vm11, %vm396_vm12 }
  0x9f   : > { %vm399_vm15 = vmor %vm379_vm10, %vm395_vm13 }
  0xa0   : > { %vm738_vm0 = vmpackc.low %vm400_vm14, %vm399_vm15 }
  0xa1   : > { %739 = vmatmul.msk.bf16.vlgmr.msra.gmra.mxu2 %vm738_vm0, %v961_v34  ;;  %v386_v39 = vpop.permute.xlu2 %385  ;;  %vm357_vm11 = vmor %vm337_vm5, %vm353_vm6 }
  0xa2   : > { %vm394_vm8 = vcmp.eq.s32.totalorder %v324_v27, %v386_v39 }
  0xa3   : > { %v531_v42 = vpop.f32.mrf.mxu1 }
  0xa5   : > { %v330_v35 = vpop.permute.xlu1 %329  ;;  %v346_v37 = vpop.permute.xlu0 %345 }
  0xa6   : > { %vm354_vm1 = vcmp.eq.s32.totalorder %v324_v27, %v346_v37  ;;  %vm338_vm2 = vcmp.eq.s32.totalorder %v324_v27, %v330_v35 }
  0xa7   : > { %vm358_vm4 = vmor %vm338_vm2, %vm354_vm1 }
  0xa8   : > { %vm378_vm7 = vmor %vm358_vm4, %vm374_vm3 }
  0xa9   : > { %vm398_vm10 = vmor %vm378_vm7, %vm394_vm8 }
  0xab   : > { %v534_v43 = vpop.f32.mrf.mxu1 }
  0xae   : > { %v363_v38 = vpop.permute.xlu1 %362 }
  0xaf   : > { %vm373_vm9 = vcmp.eq.s32.totalorder %v324_v27, %v363_v38 }
  0xb0   : > { %vm377_vm12 = vmor %vm357_vm11, %vm373_vm9 }
  0xb3   : > { %v536_v46 = vpop.f32.mrf.mxu1 }
  0xb7   : > { %v383_v40 = vpop.permute.xlu1 %382 }
  0xb8   : > { %vm393_vm13 = vcmp.eq.s32.totalorder %v324_v27, %v383_v40 }
  0xb9   : > { %vm397_vm14 = vmor %vm377_vm12, %vm393_vm13 }
  0xba   : > { %vm736_vm15 = vmpackc.low %vm398_vm10, %vm397_vm14 }
  0xbb   : > { %737 = vmatmul.msk.bf16.vlgmr.msra.gmra.mxu0 %vm736_vm15, %v961_v34 }
 0x124   : > { %v489_v44 = vpop.f32.mrf.mxu2 }
 0x125   : > { %v535_v47 = vadd.f32 %v534_v43, %v489_v44 }
 0x127   : > { %v549_v52 = vadd.f32 %v779_v48, %v535_v47 }
 0x12c   : > { %v491_v50 = vpop.f32.mrf.mxu2 }
 0x12d   : > { %v537_v51 = vadd.f32 %v536_v46, %v491_v50 }
 0x12f   : > { %v550_v53 = vadd.f32 %v780_v49, %v537_v51 }
 0x131   : > { %v789_v54 = vpack.c.bf16 %v550_v53, %v549_v52 }
 0x133   : > { %792 = vst [vmem:[%s284_s11 + $0x8] sm:$0xff] %v789_v54  }
 0x138   : > { %v484_v55 = vpop.f32.mrf.mxu0 }
 0x139   : > { %v530_v57 = vadd.f32 %v529_v41, %v484_v55 }
 0x13b   : > { %v547_v62 = vadd.f32 %v775_v58, %v530_v57 }
 0x140   : > { %v486_v60 = vpop.f32.mrf.mxu0 }
 0x141   : > { %v532_v61 = vadd.f32 %v531_v42, %v486_v60 }
 0x143   : > { %v548_v63 = vadd.f32 %v776_v59, %v532_v61 }
 0x145   : > { %v784_v0 = vpack.c.bf16 %v548_v63, %v547_v62 }
 0x147   : > { %785 = vst [vmem:[%s284_s11] sm:$0xff] %v784_v0  }
 0x148   : > { %904 = shalt.err (!%p901_p5)
}
 0x149   : > { %s962_s9 = smov 64   ;;  %s963_s11 = smov 4  }
 0x14a   : > { %801 = dma.vmem_to_hbm [thread:$0]  (%p1034_p4), %s575_s24, 256, %s577_s25, %s560_s21, %s962_s9, %s962_s9, %s963_s11  }
 0x14b PF: > { %p807_p6 = scmp.ge.s32.totalorder %s955_s23, 2  ;;  %s591_s14 = sand.u32 1, %s935_s18  }
 0x14c   : > { %s592_s15 = scalar_lea.sflag [#allocation3], %s591_s14 }
 0x14d   : > { %p804_p7 = pnand %p807_p6, %p1041_p8 }
 0x14f   : > { %p805_p9 = pneg %p804_p7 }
 0x151   : > { %930 = dma.done.wait (%p805_p9), %s592_s15, 256  }
 0x152   : > { %932 = vsyncadd (%p805_p9), %s592_s15, 4294967040  ;;  %s18_s23 = sadd.s32 1, %s955_s23   ;;  %s1146_s18 = smov %s939_s19 }
 0x153   : > { %p15_p10 = scmp.ge.s32.totalorder %s18_s23, 4   ;;  %s1147_s19 = smov %s943_s20 }
 0x154   : > { %s1148_s20 = smov %s1047_s6  ;;  %s1149_s21 = smov %s951_s22 }
 0x155   : > { %s1150_s22 = smov %s1152_s26  ;;  %17 = sbr.rel (!%p15_p10) target bundleno = 4 (0x4), region = 81 }
 0x15a   :  { %598 = vsyncpa [#allocation3], 1 }
 0x15b   :  { %600 = vsyncpa [#allocation3 + $0x1], 1 }

</bundles_post_ra>
